<compile_context>
chip_gen: v5e
topology: v5e:2x2
jax: 0.10.0
libtpu: 0.0.40
codegen_flags: <defaults>
</compile_context>

<pallas_src>
import functools
import math

import jax
import jax.numpy as jnp
from jax.experimental import pallas as pl
from jax.experimental.pallas import tpu as pltpu

_LANE = 128
_DEFAULT_BLOCK_N = 131072      # ~2.6 MiB f32 logits (C=5) per buffer -> ~7 MiB pipelined
_SMALL_N_THRESHOLD = 4096      # below this, plain XLA beats transpose + kernel launch


def _taylor_ce_kernel(pred_ref, tgt_ref, out_ref, *, classes, n_taylor, smoothing):
    # pred_ref: (C, bn) logits block, classes on sublanes, batch on lanes.
    # tgt_ref : (1, bn) int32 class indices.
    # out_ref : (1, bn) per-column (per-sample) smoothed loss.
    x = pred_ref[...].astype(jnp.float32)                       # (C, bn)

    # Taylor expansion of exp in Horner form: fn = sum_{i<=n} x^i / i!
    fn = jnp.full_like(x, jnp.float32(1.0 / math.factorial(n_taylor)))
    for i in range(n_taylor - 1, -1, -1):                       # static unroll
        fn = fn * x + jnp.float32(1.0 / math.factorial(i))

    # log(taylor_softmax)[c] = log(fn_c) - log(sum_c fn_c).
    # The PyTorch forward applies a second log_softmax, but exp(log ts) sums to 1 by
    # construction, so it is an identity up to float rounding and is dropped here
    # (intentional, rounding-level deviation only).
    log_fn = jnp.log(fn)                                        # (C, bn)
    log_s = jnp.log(jnp.sum(fn, axis=0, keepdims=True))         # (1, bn)

    # Smoothed CE per column without materializing true_dist.  With
    # conf = 1 - smoothing, off = smoothing/(C-1) and off*(C-1) + conf == 1:
    #   -sum_c(true_dist * (log_fn_c - log_s))
    #     = log_s - off*sum_c(log_fn) - (conf - off)*log_fn[target]
    confidence = jnp.float32(1.0 - smoothing)
    off_val = jnp.float32(smoothing / (classes - 1))
    tgt = tgt_ref[...]                                          # (1, bn) int32
    row = jax.lax.broadcasted_iota(jnp.int32, log_fn.shape, 0)  # class index per sublane
    sum_log_fn = jnp.sum(log_fn, axis=0, keepdims=True)         # (1, bn)
    tgt_log_fn = jnp.sum(jnp.where(row == tgt, log_fn, 0.0),
                         axis=0, keepdims=True)                 # (1, bn) = log_fn[target]
    out_ref[...] = log_s - off_val * sum_log_fn - (confidence - off_val) * tgt_log_fn


def _taylor_ce_xla(logits, labels, *, classes, n, smoothing):
    """Small-N fast path: fused XLA graph, same (simplified) math as the kernel."""
    x = logits.astype(jnp.float32)                              # (N, C)
    fn = jnp.full_like(x, 1.0 / math.factorial(n))
    for i in range(n - 1, -1, -1):
        fn = fn * x + jnp.float32(1.0 / math.factorial(i))
    log_fn = jnp.log(fn)
    log_s = jnp.log(jnp.sum(fn, axis=-1))
    confidence = 1.0 - smoothing
    off_val = smoothing / (classes - 1)
    tgt_log_fn = jnp.take_along_axis(
        log_fn, labels.astype(jnp.int32)[:, None], axis=-1)[:, 0]
    per = log_s - off_val * jnp.sum(log_fn, axis=-1) - (confidence - off_val) * tgt_log_fn
    return jnp.mean(per)


def taylor_cross_entropy_loss(logits, labels, *, n=2, smoothing=0.05,
                              block_n=None, class_major=False, force_pallas=False):
    """Pallas equivalent of TaylorCrossEntropyLoss(n, smoothing).forward.

    logits: (N, C), or (C, N) if class_major=True (avoids the wrapper transpose).
    Note: like the PyTorch module, `ignore_index` is stored but never used in the
    forward pass, and reduction is 'mean' (via LabelSmoothingLoss's torch.mean).
    """
    assert n % 2 == 0
    if class_major:
        C, N = logits.shape
    else:
        N, C = logits.shape
    assert C >= 2, "smoothing/(classes-1) undefined for classes < 2"

    # Small-N fast path: kernel launch + transpose cost more than the work itself.
    if not force_pallas and N < _SMALL_N_THRESHOLD:
        x = jnp.transpose(logits, (1, 0)) if class_major else logits
        return _taylor_ce_xla(x, labels, classes=C, n=n, smoothing=float(smoothing))

    # TODO(synk): the remaining HBM round trip is this transpose; to remove it, the
    # producer (final projection) should emit class-major (C, N) logits directly and
    # callers should pass class_major=True.
    pred_t = logits if class_major else jnp.transpose(logits, (1, 0))   # (C, N)
    tgt2d = labels.astype(jnp.int32).reshape(1, N)                      # (1, N)

    # Block-size selection: big lane-aligned column blocks (per-step compute >> the
    # ~0.35 us pipeline overhead), bounded so the double-buffered footprint stays
    # ~7 MiB (fits v5e/v6e default scoped VMEM and v7x's 64 MiB), and an even number
    # (>=2) of blocks when N is large so both v7x TensorCores get work.  No padding:
    # the ragged last block's garbage columns are sliced away below.
    if block_n is None:
        if N <= _DEFAULT_BLOCK_N:
            block_n = N
        else:
            nb = -(-N // _DEFAULT_BLOCK_N)
            if nb % 2:
                nb += 1
            block_n = ((-(-N // nb)) + _LANE - 1) // _LANE * _LANE
    else:
        if N <= block_n:
            block_n = N
        else:
            block_n = max(_LANE, (block_n // _LANE) * _LANE)

    grid = (pl.cdiv(N, block_n),)

    per_col = pl.pallas_call(
        functools.partial(
            _taylor_ce_kernel,
            classes=C,
            n_taylor=n,
            smoothing=float(smoothing),
        ),
        out_shape=jax.ShapeDtypeStruct((1, N), jnp.float32),
        grid_spec=pltpu.PrefetchScalarGridSpec(
            num_scalar_prefetch=0,
            grid=grid,
            in_specs=[
                pl.BlockSpec((C, block_n), lambda i: (0, i)),   # logits (class-major)
                pl.BlockSpec((1, block_n), lambda i: (0, i)),   # targets
            ],
            out_specs=pl.BlockSpec((1, block_n), lambda i: (0, i)),  # per-sample loss
        ),
        compiler_params=pltpu.CompilerParams(
            dimension_semantics=("parallel",)),                 # disjoint blocks -> megacore OK
    )(pred_t, tgt2d)

    # Tiny final reduction (N floats) in JAX; ragged-block garbage columns discarded.
    return jnp.mean(per_col[0, :N])


def _reference_loss(logits, labels, classes, smoothing, n):
    """Pure-JAX reference mirroring the PyTorch forward exactly."""
    x = logits.astype(jnp.float32)
    fn = jnp.ones_like(x)
    denor = 1.0
    for i in range(1, n + 1):
        denor *= i
        fn = fn + x**i / denor
    ts = fn / jnp.sum(fn, axis=1, keepdims=True)                # TaylorSoftmax(dim=1)
    logp = jnp.log(ts)
    logp = jax.nn.log_softmax(logp, axis=-1)                    # LabelSmoothingLoss
    confidence = 1.0 - smoothing
    off_val = smoothing / (classes - 1)
    onehot = jax.nn.one_hot(labels, classes, dtype=jnp.float32)
    true_dist = onehot * confidence + (1.0 - onehot) * off_val
    return jnp.mean(jnp.sum(-true_dist * logp, axis=-1))


if __name__ == "__main__":
    classes = 5          # CFG.target_size
    smoothing = 0.05     # CFG.smoothing
    n_taylor = 2

    key = jax.random.PRNGKey(0)
    k1, k2, k3, k4 = jax.random.split(key, 4)

    # Small shape matching the module's config (batch_size=16, 5 classes).
    pred = jax.random.normal(k1, (16, classes), dtype=jnp.float32)
    target = jax.random.randint(k2, (16,), 0, classes, dtype=jnp.int32)
    ref = _reference_loss(pred, target, classes, smoothing, n_taylor)

    # Pallas kernel path (forced, so the kernel actually runs at this small N).
    loss = taylor_cross_entropy_loss(pred, target, n=n_taylor, smoothing=smoothing,
                                     force_pallas=True)
    loss = jax.block_until_ready(loss)
    assert jnp.allclose(loss, ref, rtol=1e-5, atol=1e-5), (loss, ref)

    # Auto path (small-N fused-XLA fast path).
    loss_fast = taylor_cross_entropy_loss(pred, target, n=n_taylor, smoothing=smoothing)
    loss_fast = jax.block_until_ready(loss_fast)
    assert jnp.allclose(loss_fast, ref, rtol=1e-5, atol=1e-5), (loss_fast, ref)

    # Multi-block + ragged last block (no padding): N=300 with block_n=128.
    pred2 = jax.random.normal(k3, (300, classes), dtype=jnp.float32)
    target2 = jax.random.randint(k4, (300,), 0, classes, dtype=jnp.int32)
    loss2 = taylor_cross_entropy_loss(pred2, target2, n=n_taylor, smoothing=smoothing,
                                      block_n=128, force_pallas=True)
    loss2 = jax.block_until_ready(loss2)
    ref2 = _reference_loss(pred2, target2, classes, smoothing, n_taylor)
    assert jnp.allclose(loss2, ref2, rtol=1e-5, atol=1e-5), (loss2, ref2)

    # Class-major input path (skips the wrapper transpose).
    loss3 = taylor_cross_entropy_loss(pred2.T, target2, n=n_taylor, smoothing=smoothing,
                                      block_n=128, class_major=True, force_pallas=True)
    loss3 = jax.block_until_ready(loss3)
    assert jnp.allclose(loss3, ref2, rtol=1e-5, atol=1e-5), (loss3, ref2)

    print("KERNEL_OK")
</pallas_src>

<mosaic_0001>
module attributes {stable_mosaic.version = 11 : i64} {
  func.func @_taylor_ce_kernel(%arg0: i32, %arg1: memref<5x16xf32, #tpu.memory_space<vmem>>, %arg2: memref<1x16xi32, #tpu.memory_space<vmem>>, %arg3: memref<1x16xf32, #tpu.memory_space<vmem>>) attributes {dimension_semantics = [#tpu.dimension_semantics<parallel>], iteration_bounds = array<i64: 1>, scalar_prefetch = 0 : i64, scratch_operands = 0 : i64, tpu.core_type = #tpu.core_type<tc>, window_params = [{transform_indices = @transform_0, window_bounds = array<i64: 5, 16>}, {transform_indices = @transform_1, window_bounds = array<i64: 1, 16>}, {transform_indices = @transform_2, window_bounds = array<i64: 1, 16>}]} {
    %c0 = arith.constant 0 : index
    %c0_0 = arith.constant 0 : index
    %0 = vector.load %arg1[%c0, %c0_0] : memref<5x16xf32, #tpu.memory_space<vmem>>, vector<5x16xf32>
    %cst = arith.constant 5.000000e-01 : f32
    %1 = vector.broadcast %cst : f32 to vector<5x16xf32>
    %2 = arith.mulf %1, %0 : vector<5x16xf32>
    %cst_1 = arith.constant 1.000000e+00 : f32
    %3 = vector.broadcast %cst_1 : f32 to vector<5x16xf32>
    %4 = arith.addf %2, %3 : vector<5x16xf32>
    %5 = arith.mulf %4, %0 : vector<5x16xf32>
    %cst_2 = arith.constant 1.000000e+00 : f32
    %6 = vector.broadcast %cst_2 : f32 to vector<5x16xf32>
    %7 = arith.addf %5, %6 : vector<5x16xf32>
    %8 = math.log %7 : vector<5x16xf32>
    %cst_3 = arith.constant dense<0.000000e+00> : vector<16xf32>
    %9 = vector.multi_reduction <add>, %7, %cst_3 [0] : vector<5x16xf32> to vector<16xf32>
    %10 = vector.shape_cast %9 : vector<16xf32> to vector<1x16xf32>
    %11 = math.log %10 : vector<1x16xf32>
    %c0_4 = arith.constant 0 : index
    %c0_5 = arith.constant 0 : index
    %12 = vector.load %arg2[%c0_4, %c0_5] : memref<1x16xi32, #tpu.memory_space<vmem>>, vector<1x16xi32>
    %13 = tpu.iota {dimensions = array<i32: 0>} : vector<5x16xi32>
    %cst_6 = arith.constant dense<0.000000e+00> : vector<16xf32>
    %14 = vector.multi_reduction <add>, %8, %cst_6 [0] : vector<5x16xf32> to vector<16xf32>
    %15 = vector.shape_cast %14 : vector<16xf32> to vector<1x16xf32>
    %16 = vector.broadcast %12 : vector<1x16xi32> to vector<5x16xi32>
    %17 = arith.cmpi eq, %13, %16 : vector<5x16xi32>
    %cst_7 = arith.constant 0.000000e+00 : f32
    %18 = vector.broadcast %cst_7 : f32 to vector<5x16xf32>
    %19 = arith.select %17, %8, %18 : vector<5x16xi1>, vector<5x16xf32>
    %cst_8 = arith.constant dense<0.000000e+00> : vector<16xf32>
    %20 = vector.multi_reduction <add>, %19, %cst_8 [0] : vector<5x16xf32> to vector<16xf32>
    %21 = vector.shape_cast %20 : vector<16xf32> to vector<1x16xf32>
    %cst_9 = arith.constant 1.250000e-02 : f32
    %22 = vector.broadcast %cst_9 : f32 to vector<1x16xf32>
    %23 = arith.mulf %22, %15 : vector<1x16xf32>
    %24 = arith.subf %11, %23 : vector<1x16xf32>
    %cst_10 = arith.constant 0.949999988 : f32
    %cst_11 = arith.constant 1.250000e-02 : f32
    %25 = arith.subf %cst_10, %cst_11 : f32
    %26 = vector.broadcast %25 : f32 to vector<1x16xf32>
    %27 = arith.mulf %26, %21 : vector<1x16xf32>
    %28 = arith.subf %24, %27 : vector<1x16xf32>
    %c0_12 = arith.constant 0 : index
    %c0_13 = arith.constant 0 : index
    %29 = vector.load %arg3[%c0_12, %c0_13] : memref<1x16xf32, #tpu.memory_space<vmem>>, vector<1x16xf32>
    tpu.vector_store %arg3[%c0_12, %c0_13], %28 {strides = array<i32>} : memref<1x16xf32, #tpu.memory_space<vmem>>, vector<1x16xf32>,
    return
  }
  func.func @transform_0(%arg0: i32) -> (i32, i32) {
    %c0_i32 = arith.constant 0 : i32
    %c0_i32_0 = arith.constant 0 : i32
    return %c0_i32, %arg0 : i32, i32
  }
  func.func @transform_1(%arg0: i32) -> (i32, i32) {
    %c0_i32 = arith.constant 0 : i32
    %c0_i32_0 = arith.constant 0 : i32
    return %c0_i32, %arg0 : i32, i32
  }
  func.func @transform_2(%arg0: i32) -> (i32, i32) {
    %c0_i32 = arith.constant 0 : i32
    %c0_i32_0 = arith.constant 0 : i32
    return %c0_i32, %arg0 : i32, i32
  }
}

</mosaic_0001>

<bundles_post_ra>
// kernel: tpu_custom_call.1
= control target key start
LH: loop header
LB: loop body
LE: loop exit
PB: predicated region body
PF: predicated region fallthrough
CT: control target
= control target key end

     0   :  { %7 = vsyncpa [#allocation3], 0  ;;  %s217_s0 = inlined_call_operand.hbm [shape: f32[5,16], index: 0, kind: input, shape index: {}]   ;;  %s218_s1 = inlined_call_operand.hbm [shape: s32[1,16], index: 1, kind: input, shape index: {}]   ;;  %s219_s2 = inlined_call_operand.hbm [shape: f32[1,16], index: 2, kind: output, shape index: {}]  }
   0x1   :  { %8 = vsyncpa [#allocation6], 0 }
   0x2   :  { %9 = vsyncpa [#allocation4], 0  ;;  %s15_s11 = sshll.u32 %s217_s0, 4  ;;  %s187_s12 = smov [#allocation2]   ;;  %s16_s11 = int_to_ptr.hbm [resolvable:$true] %s15_s11 }
   0x3   :  { %s17_s13 = sshll.u32 %s187_s12, 4  ;;  %s26_s16 = sshll.u32 %s218_s1, 4  ;;  %s18_s13 = int_to_ptr.vmem [resolvable:$true] %s17_s13  ;;  %s27_s16 = int_to_ptr.hbm [resolvable:$true] %s26_s16 }
   0x4   :  { %20 = dma.hbm_to_vmem [thread:$0]  %s16_s11, 128, %s18_s13, [#allocation3]  }
   0x5   :  { %s188_s17 = smov [#allocation5]  }
   0x6   :  { %s28_s18 = sshll.u32 %s188_s17, 4  ;;  %s29_s18 = int_to_ptr.vmem [resolvable:$true] %s28_s18 }
   0x7   :  { %31 = dma.hbm_to_vmem [thread:$0]  %s27_s16, 16, %s29_s18, [#allocation6]  }
   0x8   :  { %181 = dma.done.wait [#allocation3], 128  }
   0x9   :  { %182 = vsyncadd [#allocation3], 4294967168 }
   0xa   :  { %183 = dma.done.wait [#allocation6], 16  }
   0xb   :  { %184 = vsyncadd [#allocation6], 4294967280  ;;  %v40_v0 = vld [vmem:[#allocation2] sm:$0x1f]  ;;  %vm47_vm0 = vcmask 126976   ;;  %v58_v5 = vlaneseq  ;;  %s189_s0 = smov [#allocation7]  }
   0xc   :  { %v41_v1 = vmul.f32 0.5, %v40_v0  ;;  %v104_v9 = vld [vmem:[#allocation5] ss:$0 sm:$0xff]  ;;  %s88_s1 = sshll.u32 %s189_s0, 4  ;;  %s90_s21 = sshll.u32 %s219_s2, 4  ;;  %vm81_vm2 = vcmask 122880   ;;  %s89_s1 = int_to_ptr.vmem [resolvable:$true] %s88_s1  ;;  %s91_s21 = int_to_ptr.hbm [resolvable:$true] %s90_s21 }
   0xd   :  { %v59_v8 = vshrl.u32 %v58_v5, 7 }
   0xe   :  { %v42_v2 = vadd.f32 1.0, %v41_v1 }
   0xf   :  { %vm68_vm1 = vcmp.eq.s32.totalorder %v59_v8, %v104_v9 }
  0x10   :  { %v43_v3 = vmul.f32 %v42_v2, %v40_v0 }
  0x12   :  { %v44_v4 = vadd.f32 1.0, %v43_v3 }
  0x14   :  { %105 = vlog2.f32 %v44_v4  ;;  %v48_v6 = vsel %vm47_vm0, %v44_v4, 0.0 }
  0x15   :  { %v49_v7 = vrot.slane %v48_v6, 4 }
  0x17   :  { %v50_v10 = vadd.f32 %v49_v7, %v48_v6 }
  0x19   :  { %v51_v11 = vrot.slane %v50_v10, 2 }
  0x1a   :  { %v106_v12 = vpop.eup %105 }
  0x1b   :  { %v46_v13 = vmul.f32 0.6931472, %v106_v12  ;;  %v52_v14 = vadd.f32 %v51_v11, %v50_v10 }
  0x1d   :  { %v53_v15 = vrot.slane %v52_v14, 1  ;;  %v60_v16 = vsel %vm47_vm0, %v46_v13, 0.0  ;;  %v69_v17 = vsel %vm68_vm1, %v46_v13, 0.0 }
  0x1e   :  { %v61_v18 = vrot.slane %v60_v16, 4  ;;  %v70_v19 = vsel %vm47_vm0, %v69_v17, 0.0 }
  0x1f   :  { %v54_v20 = vadd.f32 %v53_v15, %v52_v14  ;;  %v71_v21 = vrot.slane %v70_v19, 4 }
  0x20   :  { %v62_v22 = vadd.f32 %v61_v18, %v60_v16 }
  0x21   :  { %107 = vlog2.f32 %v54_v20  ;;  %v72_v23 = vadd.f32 %v71_v21, %v70_v19 }
  0x22   :  { %v63_v24 = vrot.slane %v62_v22, 2 }
  0x23   :  { %v73_v25 = vrot.slane %v72_v23, 2 }
  0x24   :  { %v64_v26 = vadd.f32 %v63_v24, %v62_v22 }
  0x25   :  { %v74_v27 = vadd.f32 %v73_v25, %v72_v23 }
  0x26   :  { %v65_v28 = vrot.slane %v64_v26, 1 }
  0x27   :  { %v108_v29 = vpop.eup %107  ;;  %v75_v30 = vrot.slane %v74_v27, 1 }
  0x28   :  { %v56_v31 = vmul.f32 0.6931472, %v108_v29  ;;  %v66_v32 = vadd.f32 %v65_v28, %v64_v26 }
  0x29   :  { %v76_v33 = vadd.f32 %v75_v30, %v74_v27 }
  0x2a   :  { %v77_v34 = vmul.f32 0.0125, %v66_v32 }
  0x2b   :  { %v79_v35 = vmul.f32 0.9375, %v76_v33 }
  0x2c   :  { %v78_v36 = vsub.f32 %v56_v31, %v77_v34 }
  0x2e   :  { %v80_v37 = vsub.f32 %v78_v36, %v79_v35 }
  0x30   :  { %82 = vst.msk [vmem:[#allocation7] sm:$0x1] %vm81_vm2, %v80_v37 }
  0x31   :  { %93 = dma.vmem_to_hbm [thread:$0]  %s89_s1, 16, %s91_s21, [#allocation4]  }
  0x32   :  { %185 = dma.done.wait [#allocation4], 16  }
  0x33   :  { %186 = vsyncadd [#allocation4], 4294967280 }
  0x34   :  { %98 = vsyncpa [#allocation3], 1 }
  0x35   :  { %99 = vsyncpa [#allocation6], 1 }
  0x36   :  { %100 = vsyncpa [#allocation4], 1 }

</bundles_post_ra>
